<compile_context>
chip_gen: v7x
topology: tpu7x:2x2x1
jax: 0.10.0
libtpu: 0.0.40
codegen_flags: <defaults>
</compile_context>

<pallas_src>
import jax
import jax.numpy as jnp
from jax import lax
from jax.experimental import pallas as pl
from jax.experimental.pallas import tpu as pltpu

_EPS = 1e-5


# ----------------------------------------------------------------------------
# Kernel bodies
# ----------------------------------------------------------------------------
def _withbias_ln_kernel(x_ref, w_ref, b_ref, o_ref):
    # x_ref/o_ref: (1, C, T) ; w_ref/b_ref: (1, C, 1).  Normalize over C (sublanes).
    x = x_ref[...].astype(jnp.float32)
    c = x.shape[1]
    inv_c = 1.0 / c
    mu = jnp.sum(x, axis=1, keepdims=True) * inv_c             # (1, 1, T)
    ex2 = jnp.sum(x * x, axis=1, keepdims=True) * inv_c        # (1, 1, T)
    var = jnp.maximum(ex2 - mu * mu, 0.0)                      # fused form: no xc live
    inv = lax.rsqrt(var + _EPS)                                # (1, 1, T)
    w = w_ref[...].astype(jnp.float32)                         # (1, C, 1)
    b = b_ref[...].astype(jnp.float32)
    # (x - mu) * inv * w + b, written so only `x` is the full-size live array.
    o_ref[...] = ((x * inv - mu * inv) * w + b).astype(o_ref.dtype)


def _biasfree_ln_kernel(x_ref, w_ref, o_ref):
    # BiasFree_LayerNorm: variance about the mean, numerator NOT centered.
    x = x_ref[...].astype(jnp.float32)
    c = x.shape[1]
    inv_c = 1.0 / c
    mu = jnp.sum(x, axis=1, keepdims=True) * inv_c
    ex2 = jnp.sum(x * x, axis=1, keepdims=True) * inv_c
    var = jnp.maximum(ex2 - mu * mu, 0.0)
    inv = lax.rsqrt(var + _EPS)
    w = w_ref[...].astype(jnp.float32)
    o_ref[...] = (x * inv * w).astype(o_ref.dtype)


# ----------------------------------------------------------------------------
# Generation-aware tiling
# ----------------------------------------------------------------------------
def _chip_traits():
    """(per-block budget bytes, vmem_limit_bytes, multi_tensorcore)."""
    kind = ""
    try:
        kind = jax.devices()[0].device_kind.lower()
    except Exception:
        pass
    budget, limit, multi_tc = 4 << 20, 32 << 20, False    # safe default
    if "v6" in kind:
        budget, limit = 8 << 20, 64 << 20                 # 128 MiB physical, ~1.4 TB/s
    elif "v5" in kind:
        budget, limit = 6 << 20, 48 << 20                 # 128 MiB physical, ~0.8 TB/s
    elif "7" in kind:                                      # v7x: 64 MiB physical, 3.2 TB/s, 2 TCs
        budget, limit, multi_tc = 5 << 20, 40 << 20, True
    return budget, limit, multi_tc


def _pick_hw_tile(hw: int, c: int, itemsize: int, budget_bytes: int, want_steps: int) -> int:
    """Balanced lane tile for the H*W axis: a multiple of 128 (or the full
    extent), chosen so the spatial axis is split into equal-ish tiles that
    each respect the per-block VMEM budget."""
    if hw <= 128:
        return hw                                          # full extent (== array dim)
    budget_lanes = max(128, (budget_bytes // max(1, c * itemsize)) // 128 * 128)
    n = pl.cdiv(hw, budget_lanes)                          # steps needed for the budget
    n = max(n, want_steps)                                 # keep both v7x cores busy
    tile = pl.cdiv(hw, n)
    tile = ((tile + 127) // 128) * 128                     # lane-dense tiles
    if tile >= hw:
        tile = hw                                          # full extent (always legal)
    return tile


# ----------------------------------------------------------------------------
# Wrapper
# ----------------------------------------------------------------------------
def _layernorm_nchw(x, weight, bias):
    """x: (B, C, H, W); layer-norm over C; NCHW in, NCHW out."""
    b, c, h, w = x.shape
    hw = h * w
    x3 = x.reshape(b, c, hw)                               # free view, no transpose

    budget, vmem_limit, multi_tc = _chip_traits()
    want_steps = 2 if (multi_tc and b < 2) else 1          # only split for the 2nd TC on v7x
    tile = _pick_hw_tile(hw, c, x.dtype.itemsize, budget, want_steps)
    grid = (b, pl.cdiv(hw, tile))

    x_spec = pl.BlockSpec((1, c, tile), lambda bi, si: (bi, 0, si))
    p_spec = pl.BlockSpec((1, c, 1), lambda bi, si: (0, 0, 0))
    o_spec = pl.BlockSpec((1, c, tile), lambda bi, si: (bi, 0, si))
    out_shape = jax.ShapeDtypeStruct((b, c, hw), x.dtype)

    cparams = pltpu.CompilerParams(
        dimension_semantics=("parallel", "parallel"),
        vmem_limit_bytes=vmem_limit,
    )
    cost = pl.CostEstimate(
        flops=8 * b * c * hw,                              # sums, squares, scale, shift
        transcendentals=b * hw,                            # one rsqrt per pixel
        bytes_accessed=2 * b * c * hw * x.dtype.itemsize + 2 * c * 4,
    )

    if bias is None:
        y3 = pl.pallas_call(
            _biasfree_ln_kernel,
            out_shape=out_shape,
            grid_spec=pltpu.PrefetchScalarGridSpec(
                num_scalar_prefetch=0,
                grid=grid,
                in_specs=[x_spec, p_spec],
                out_specs=o_spec,
            ),
            compiler_params=cparams,
            cost_estimate=cost,
        )(x3, weight.reshape(1, c, 1))
    else:
        y3 = pl.pallas_call(
            _withbias_ln_kernel,
            out_shape=out_shape,
            grid_spec=pltpu.PrefetchScalarGridSpec(
                num_scalar_prefetch=0,
                grid=grid,
                in_specs=[x_spec, p_spec, p_spec],
                out_specs=o_spec,
            ),
            compiler_params=cparams,
            cost_estimate=cost,
        )(x3, weight.reshape(1, c, 1), bias.reshape(1, c, 1))

    return y3.reshape(b, c, h, w)                          # free view back to NCHW


class LayerNorm:
    """Pallas port of the FSAS LayerNorm: NCHW in, NCHW out, normalize over C.
    'WithBias' matches WithBias_LayerNorm ((x-mu)/sqrt(var+eps)*w + b);
    'BiasFree' matches BiasFree_LayerNorm (x/sqrt(var+eps)*w, var about mean)."""

    def __init__(self, dim: int, LayerNorm_type: str = "WithBias"):
        self.dim = dim
        self.type = LayerNorm_type
        self.weight = jnp.ones((dim,), dtype=jnp.float32)
        if LayerNorm_type == "BiasFree":
            self.bias = None
        else:
            self.bias = jnp.zeros((dim,), dtype=jnp.float32)

    def __call__(self, x):
        b, c, h, w = x.shape
        assert c == self.dim
        return _layernorm_nchw(x, self.weight, self.bias)


# ----------------------------------------------------------------------------
# Reference + self-test
# ----------------------------------------------------------------------------
def _reference(x, weight, bias):
    # Pure-JAX model of the PyTorch forward (to_3d -> LayerNorm(C) -> to_4d).
    b, c, h, w = x.shape
    x3 = jnp.transpose(x, (0, 2, 3, 1)).reshape(b, h * w, c).astype(jnp.float32)
    mu = jnp.mean(x3, axis=-1, keepdims=True)
    var = jnp.mean((x3 - mu) ** 2, axis=-1, keepdims=True)
    if bias is None:
        y3 = x3 / jnp.sqrt(var + _EPS) * weight
    else:
        y3 = (x3 - mu) / jnp.sqrt(var + _EPS) * weight + bias
    return y3.reshape(b, h, w, c).transpose(0, 3, 1, 2).astype(x.dtype)


if __name__ == "__main__":
    key = jax.random.PRNGKey(0)
    ok = True

    # Small canonical shape from the module spec.
    B, C, H, W = 2, 4, 16, 16
    x = jax.random.normal(key, (B, C, H, W), dtype=jnp.float32)
    for ln_type in ("WithBias", "BiasFree"):
        ln = LayerNorm(C, ln_type)
        y = jax.block_until_ready(ln(x))
        ref = _reference(x, ln.weight, ln.bias)
        if y.shape != x.shape or not jnp.allclose(y, ref, atol=1e-5, rtol=1e-5):
            ok = False

    # Extra coverage: larger channel count (multi-vreg sublane path).
    k2 = jax.random.PRNGKey(1)
    C2 = 48
    x2 = jax.random.normal(k2, (2, C2, 16, 16), dtype=jnp.float32)
    ln2 = LayerNorm(C2, "WithBias")
    y2 = jax.block_until_ready(ln2(x2))
    ref2 = _reference(x2, ln2.weight, ln2.bias)
    if y2.shape != x2.shape or not jnp.allclose(y2, ref2, atol=1e-4, rtol=1e-4):
        ok = False

    if ok:
        print("KERNEL_OK")
</pallas_src>

<mosaic_0001>
module attributes {stable_mosaic.version = 11 : i64} {
  func.func @_withbias_ln_kernel(%arg0: i32, %arg1: i32, %arg2: memref<1x4x256xf32, #tpu.memory_space<vmem>>, %arg3: memref<1x4x1xf32, #tpu.memory_space<vmem>>, %arg4: memref<1x4x1xf32, #tpu.memory_space<vmem>>, %arg5: memref<1x4x256xf32, #tpu.memory_space<vmem>>) attributes {dimension_semantics = [#tpu.dimension_semantics<parallel>, #tpu.dimension_semantics<parallel>], iteration_bounds = array<i64: 2, 1>, scalar_prefetch = 0 : i64, scratch_operands = 0 : i64, tpu.core_type = #tpu.core_type<tc>, window_params = [{transform_indices = @transform_0, window_bounds = array<i64: 1, 4, 256>}, {pipeline_mode = #tpu.pipeline_mode<synchronous>, transform_indices = @transform_1, window_bounds = array<i64: 1, 4, 1>}, {pipeline_mode = #tpu.pipeline_mode<synchronous>, transform_indices = @transform_2, window_bounds = array<i64: 1, 4, 1>}, {transform_indices = @transform_3, window_bounds = array<i64: 1, 4, 256>}]} {
    %c0 = arith.constant 0 : index
    %c0_0 = arith.constant 0 : index
    %c0_1 = arith.constant 0 : index
    %0 = vector.load %arg2[%c0, %c0_0, %c0_1] : memref<1x4x256xf32, #tpu.memory_space<vmem>>, vector<1x4x256xf32>
    %cst = arith.constant dense<0.000000e+00> : vector<1x256xf32>
    %1 = vector.multi_reduction <add>, %0, %cst [1] : vector<1x4x256xf32> to vector<1x256xf32>
    %2 = vector.shape_cast %1 : vector<1x256xf32> to vector<1x1x256xf32>
    %cst_2 = arith.constant 2.500000e-01 : f32
    %3 = vector.broadcast %cst_2 : f32 to vector<1x1x256xf32>
    %4 = arith.mulf %2, %3 : vector<1x1x256xf32>
    %5 = arith.mulf %0, %0 : vector<1x4x256xf32>
    %cst_3 = arith.constant dense<0.000000e+00> : vector<1x256xf32>
    %6 = vector.multi_reduction <add>, %5, %cst_3 [1] : vector<1x4x256xf32> to vector<1x256xf32>
    %7 = vector.shape_cast %6 : vector<1x256xf32> to vector<1x1x256xf32>
    %cst_4 = arith.constant 2.500000e-01 : f32
    %8 = vector.broadcast %cst_4 : f32 to vector<1x1x256xf32>
    %9 = arith.mulf %7, %8 : vector<1x1x256xf32>
    %10 = arith.mulf %4, %4 : vector<1x1x256xf32>
    %11 = arith.subf %9, %10 : vector<1x1x256xf32>
    %cst_5 = arith.constant 0.000000e+00 : f32
    %12 = vector.broadcast %cst_5 : f32 to vector<1x1x256xf32>
    %13 = arith.maximumf %11, %12 : vector<1x1x256xf32>
    %cst_6 = arith.constant 9.99999974E-6 : f32
    %14 = vector.broadcast %cst_6 : f32 to vector<1x1x256xf32>
    %15 = arith.addf %13, %14 : vector<1x1x256xf32>
    %16 = math.rsqrt %15 : vector<1x1x256xf32>
    %c0_7 = arith.constant 0 : index
    %c0_8 = arith.constant 0 : index
    %c0_9 = arith.constant 0 : index
    %17 = vector.load %arg3[%c0_7, %c0_8, %c0_9] : memref<1x4x1xf32, #tpu.memory_space<vmem>>, vector<1x4x1xf32>
    %c0_10 = arith.constant 0 : index
    %c0_11 = arith.constant 0 : index
    %c0_12 = arith.constant 0 : index
    %18 = vector.load %arg4[%c0_10, %c0_11, %c0_12] : memref<1x4x1xf32, #tpu.memory_space<vmem>>, vector<1x4x1xf32>
    %19 = vector.broadcast %16 : vector<1x1x256xf32> to vector<1x4x256xf32>
    %20 = arith.mulf %0, %19 : vector<1x4x256xf32>
    %21 = arith.mulf %4, %16 : vector<1x1x256xf32>
    %22 = vector.broadcast %21 : vector<1x1x256xf32> to vector<1x4x256xf32>
    %23 = arith.subf %20, %22 : vector<1x4x256xf32>
    %24 = vector.broadcast %17 : vector<1x4x1xf32> to vector<1x4x256xf32>
    %25 = arith.mulf %23, %24 : vector<1x4x256xf32>
    %26 = vector.broadcast %18 : vector<1x4x1xf32> to vector<1x4x256xf32>
    %27 = arith.addf %25, %26 : vector<1x4x256xf32>
    %c0_13 = arith.constant 0 : index
    %c0_14 = arith.constant 0 : index
    %c0_15 = arith.constant 0 : index
    %28 = vector.load %arg5[%c0_13, %c0_14, %c0_15] : memref<1x4x256xf32, #tpu.memory_space<vmem>>, vector<1x4x256xf32>
    tpu.vector_store %arg5[%c0_13, %c0_14, %c0_15], %27 {strides = array<i32>} : memref<1x4x256xf32, #tpu.memory_space<vmem>>, vector<1x4x256xf32>,
    return
  }
  func.func @transform_0(%arg0: i32, %arg1: i32) -> (i32, i32, i32) {
    %c0_i32 = arith.constant 0 : i32
    %c0_i32_0 = arith.constant 0 : i32
    return %arg0, %c0_i32, %arg1 : i32, i32, i32
  }
  func.func @transform_1(%arg0: i32, %arg1: i32) -> (i32, i32, i32) {
    %c0_i32 = arith.constant 0 : i32
    %c0_i32_0 = arith.constant 0 : i32
    %c0_i32_1 = arith.constant 0 : i32
    %c0_i32_2 = arith.constant 0 : i32
    return %c0_i32, %c0_i32_0, %c0_i32_1 : i32, i32, i32
  }
  func.func @transform_2(%arg0: i32, %arg1: i32) -> (i32, i32, i32) {
    %c0_i32 = arith.constant 0 : i32
    %c0_i32_0 = arith.constant 0 : i32
    %c0_i32_1 = arith.constant 0 : i32
    %c0_i32_2 = arith.constant 0 : i32
    return %c0_i32, %c0_i32_0, %c0_i32_1 : i32, i32, i32
  }
  func.func @transform_3(%arg0: i32, %arg1: i32) -> (i32, i32, i32) {
    %c0_i32 = arith.constant 0 : i32
    %c0_i32_0 = arith.constant 0 : i32
    return %arg0, %c0_i32, %arg1 : i32, i32, i32
  }
}

</mosaic_0001>

<bundles_post_ra>
// kernel: tpu_custom_call.1
= control target key start
LH: loop header
LB: loop body
LE: loop exit
PB: predicated region body
PF: predicated region fallthrough
CT: control target
= control target key end

     0   :  { %8 = vsyncpa [#allocation3], 0  ;;  %s807_s0 = inlined_call_operand.hbm [shape: f32[2,4,256], index: 0, kind: input, shape index: {}]   ;;  %s808_s1 = inlined_call_operand.vmem [shape: f32[1,4,1], index: 1, kind: input, shape index: {}]   ;;  %s809_s2 = inlined_call_operand.vmem [shape: f32[1,4,1], index: 2, kind: input, shape index: {}]   ;;  %s810_s3 = inlined_call_operand.hbm [shape: f32[2,4,256], index: 3, kind: output, shape index: {}]  }
   0x1   :  { %10 = vsyncpa [#allocation3 + $0x1], 0 }
   0x2   :  { %11 = vsyncpa [#allocation4], 0 }
   0x3   :  { %13 = vsyncpa [#allocation4 + $0x1], 0  ;;  %s625_s12 = smov 0   ;;  %s627_s13 = smov 0  }
   0x4   :  { %s629_s14 = smov 0   ;;  %s631_s15 = smov 0  }
   0x5   :  { %s633_s16 = smov 0   ;;  %s635_s17 = smov 0  }
   0x6 LB: > { %s400_s18 = sadd.s32 4294967295, %s599_s17   ;;  %s401_s19 = sadd.s32 4294967294, %s599_s17   ;;  %s599_s17 = sphi %s635_s17, %s19_s17   ;;  %s595_s16 = sphi %s633_s16, %s826_s16   ;;  %s591_s15 = sphi %s631_s15, %s825_s15   ;;  %s587_s14 = sphi %s629_s14, %s824_s14   ;;  %s583_s13 = sphi %s627_s13, %s823_s13   ;;  %s579_s12 = sphi %s625_s12, %s822_s12  }
   0x7   : > { %s31_s20 = sadd.s32 1, %s595_s16  ;;  %s40_s21 = sadd.s32 1, %s587_s14 }
   0x8   : > { %p33_p0 = scmp.ge.s32.totalorder %s31_s20, 2  ;;  %p47_p1 = scmp.ne.s32.totalorder %s587_s14, %s583_s13 }
   0x9   : > { %p48_p2 = scmp.eq.s32.totalorder %s599_s17, 0  ;;  %p53_p3 = scmp.ne.s32.totalorder %s583_s13, %s579_s12 }
   0xa   : > { %s828_s20 = smov (%p33_p0, %s31_s20), 0  ;;  %p54_p5 = scmp.eq.s32.totalorder %s400_s18, 0 }
   0xb   : > { %p666_p4 = por %p48_p2, %p47_p1  ;;  %s35_s23 = ssub.s32 %s595_s16, %s828_s20 }
   0xc   : > { %p121_p6 = scmp.eq.s32.totalorder %s400_s18, 1  ;;  %p38_p7 = scmp.eq.s32.totalorder %s35_s23, 0 }
   0xd   : > { %p672_p8 = por %p54_p5, %p53_p3  ;;  %p127_p10 = scmp.eq.s32.totalorder %s401_s19, 1 }
   0xe   : > { %p676_p9 = por %p121_p6, %p47_p1  ;;  %p429_p13 = scmp.lt.s32.totalorder %s599_s17, 2 }
   0xf   : > { %s681_s26 = scalar_select %p38_p7, %s587_s14, %s40_s21  }
  0x10   : > { %s814_s25 = scalar_select %p676_p9, 1, 0 }
  0x11   : > { %p683_p11 = por %p127_p10, %p53_p3  ;;  %s153_s28 = sand.u32 1, %s587_s14  }
  0x12   : > { %s404_s29 = sshll.u32 %s153_s28, 3  ;;  %s415_s30 = sshll.u32 %s595_s16, 7 }
  0x13   : > { %s815_s27 = scalar_select %p683_p11, 1, 0 }
  0x14   : > { %s694_s6 = scalar_lea.hbm %s807_s0, %s415_s30  ;;  %s157_s7 = scalar_lea.vmem [#allocation2], %s404_s29 }
  0x15   : > { %s167_s8 = sshll.u32 %s157_s7, 4  ;;  %p700_p0 = pnand %p429_p13, %p666_p4  ;;  %s696_s8 = int_to_ptr.vmem [resolvable:$true] %s167_s8 }
  0x16   : > { %s154_s10 = scalar_lea.sflag [#allocation3], %s153_s28  ;;  %s487_s11 = scalar_lea.hbm %s694_s6, 128 }
  0x17   : > { %p488_p3 = scmp.ne.s32.totalorder %s694_s6, %s487_s11  ;;  %p489_p5 = pneg %p700_p0 }
  0x18   : > { %s492_s21 = scalar_lea.hbm %s807_s0, 256  ;;  %p493_p4 = scmp.lt.u32.totalorder %s694_s6, %s807_s0 }
  0x19   : > { %p490_p6 = pnand %p489_p5, %p488_p3  ;;  %p494_p10 = scmp.lt.u32.totalorder %s492_s21, %s487_s11 }
  0x1a   : > { %p496_p12 = scmp.lt.u32.totalorder %s487_s11, %s694_s6 }
  0x1b   : > { %p491_p7 = pneg %p490_p6  ;;  %p495_p13 = por %p494_p10, %p493_p4 }
  0x1d   : > { %p497_p1 = por %p496_p12, %p495_p13 }
  0x1f   : > { %p498_p2 = pnand %p497_p1, %p491_p7 }
  0x21   : > { %501 = shalt.err (!%p498_p2)
}
  0x22   : > { %s502_s28 = scalar_lea.vmem %s696_s8, 128  ;;  %s601_s29 = smov [#allocation2]  }
  0x23   : > { %p503_p3 = scmp.ne.s32.totalorder %s696_s8, %s502_s28  ;;  %s507_s30 = sshll.u32 %s601_s29, 4  ;;  %s508_s30 = int_to_ptr.vmem [resolvable:$false] %s507_s30 }
  0x24   : > { %s509_s4 = scalar_lea.vmem %s508_s30, 256  ;;  %p510_p9 = scmp.lt.s32.totalorder %s696_s8, %s508_s30 }
  0x25   : > { %p505_p6 = pnand %p503_p3, %p489_p5  ;;  %p511_p4 = scmp.lt.s32.totalorder %s509_s4, %s502_s28 }
  0x27   : > { %p506_p11 = pneg %p505_p6  ;;  %p512_p10 = por %p511_p4, %p510_p9 }
  0x29   : > { %p513_p12 = pnand %p512_p10, %p506_p11 }
  0x2b   : > { %516 = shalt.err (!%p513_p12)
}
  0x2c   : > { %424 = dma.hbm_to_vmem [thread:$0]  (!%p700_p0), %s694_s6, 128, %s696_s8, %s154_s10  }
  0x2d   : > { %p817_p1 = scmp.lt.s32.totalorder %s599_s17, 3  ;;  %p818_p2 = scmp.ge.s32.totalorder %s599_s17, 1 }
  0x2f   : > { %p173_p5 = pnand %p818_p2, %p817_p1 }
  0x30   : > { %s736_s5 = sand.u32 (!%p173_p5), 1, %s583_s13  }
  0x31   : > { %176 = sbr.rel (%p173_p5) target bundleno = 209 (0xd1), region = 32  ;;  %s408_s7 = sshll.u32 (!%p173_p5), %s736_s5, 3 }
  0x32   : > { %s179_s11 = scalar_lea.sflag (!%p173_p5), [#allocation3], %s736_s5  ;;  %s182_s9 = scalar_lea.vmem (!%p173_p5), [#allocation2], %s408_s7 }
  0x38   : > { %570 = dma.done.wait (%p672_p8), %s179_s11, 128  }
  0x39   : > { %572 = vsyncadd (%p672_p8), %s179_s11, 4294967168  ;;  %v602_v0 = vmov 0   ;;  %v258_v1 = vld [vmem:[%s808_s1] sm:$0xf]  ;;  %vm211_vm0 = vcmask 1043456   ;;  %v279_v47 = vlaneseq  ;;  %s416_s24 = sshll.u32 %s591_s15, 7 }
  0x3a   : > { %481 = vset.pattern.permute.xlu0 %v602_v0  ;;  %v259_v2 = vld [vmem:[%s809_s2] sm:$0xf]  ;;  %v603_v49 = vmov 839922192   ;;  %s204_s19 = scalar_lea.vmem [#allocation5], %s408_s7  ;;  %s758_s28 = scalar_lea.hbm %s810_s3, %s416_s24 }
  0x3b   : > { %274 = vperm.xlu0 %481, %v258_v1   ;;  %v207_v3 = vld [vmem:[%s182_s9] sm:$0xff]  ;;  %v277_v50 = vunpack.c.l.s4 %v603_v49  ;;  %v280_v52 = vshrl.u32 %v279_v47, 7  ;;  %s316_s21 = sshll.u32 %s204_s19, 4  ;;  %s300_s29 = scalar_lea.sflag [#allocation4], %s736_s5  ;;  %s760_s21 = int_to_ptr.vmem [resolvable:$true] %s316_s21 }
  0x3c   : > { %v209_v4 = vcombine.high %v207_v3, %v207_v3  ;;  %v228_v5 = vmul.f32 %v207_v3, %v207_v3  ;;  %v212_v6 = vsel %vm211_vm0, %v207_v3, 0.0  ;;  %s517_s30 = scalar_lea.vmem %s760_s21, 128  ;;  %p819_p9 = scmp.ne.s32.totalorder %s814_s25, 0 }
  0x3d   : > { %v213_v9 = vrot.slane %v212_v6, 4  ;;  %v278_v53 = vunpack.c.0.s8 %v277_v50  ;;  %p518_p8 = scmp.ne.s32.totalorder %s760_s21, %s517_s30  ;;  %s604_s15 = smov [#allocation5]  }
  0x3e   : > { %v219_v7 = vsel %vm211_vm0, %v209_v4, 0.0  ;;  %v230_v8 = vcombine.high %v228_v5, %v228_v5  ;;  %v232_v11 = vsel %vm211_vm0, %v228_v5, 0.0  ;;  %s521_s4 = sshll.u32 %s604_s15, 4  ;;  %s522_s4 = int_to_ptr.vmem [resolvable:$false] %s521_s4 }
  0x3f   : > { %287 = vperm.xlu0 %481, %v259_v2   ;;  %v220_v10 = vrot.slane %v219_v7, 4  ;;  %v214_v13 = vadd.f32 %v213_v9, %v212_v6  ;;  %v233_v14 = vrot.slane %v232_v11, 4  ;;  %v281_v57 = vsub.s32 %v278_v53, %v280_v52  ;;  %p519_p11 = pnand %p518_p8, %p819_p9  ;;  %s523_s7 = scalar_lea.vmem %s522_s4, 256 }
  0x40   : > { %v239_v12 = vsel %vm211_vm0, %v230_v8, 0.0  ;;  %p524_p7 = scmp.lt.s32.totalorder %s760_s21, %s522_s4  ;;  %p525_p13 = scmp.lt.s32.totalorder %s523_s7, %s517_s30 }
  0x41   : > { %v221_v15 = vadd.f32 %v220_v10, %v219_v7  ;;  %v240_v16 = vrot.slane %v239_v12, 4  ;;  %v215_v17 = vrot.slane %v214_v13, 2  ;;  %v234_v18 = vadd.f32 %v233_v14, %v232_v11  ;;  %p520_p0 = pneg %p519_p11 }
  0x42   : > { %p526_p3 = por %p525_p13, %p524_p7 }
  0x43   : > { %v222_v19 = vrot.slane %v221_v15, 2  ;;  %v241_v20 = vadd.f32 %v240_v16, %v239_v12  ;;  %v216_v21 = vadd.f32 %v215_v17, %v214_v13  ;;  %v235_v22 = vrot.slane %v234_v18, 2 }
  0x44   : > { %p527_p6 = pnand %p526_p3, %p520_p0 }
  0x45   : > { %v223_v23 = vadd.f32 %v222_v19, %v221_v15  ;;  %v242_v24 = vrot.slane %v241_v20, 2  ;;  %v217_v25 = vrot.slane %v216_v21, 1  ;;  %v236_v26 = vadd.f32 %v235_v22, %v234_v18 }
  0x47   : > { %v224_v27 = vrot.slane %v223_v23, 1  ;;  %v243_v28 = vadd.f32 %v242_v24, %v241_v20  ;;  %v218_v29 = vadd.f32 %v217_v25, %v216_v21  ;;  %v237_v30 = vrot.slane %v236_v26, 1 }
  0x49   : > { %v225_v31 = vadd.f32 %v224_v27, %v223_v23  ;;  %v244_v32 = vrot.slane %v243_v28, 1  ;;  %v226_v33 = vmul.f32 0.25, %v218_v29  ;;  %v238_v34 = vadd.f32 %v237_v30, %v236_v26 }
  0x4b   : > { %v227_v35 = vmul.f32 0.25, %v225_v31  ;;  %v245_v36 = vadd.f32 %v244_v32, %v243_v28  ;;  %v246_v37 = vmul.f32 0.25, %v238_v34  ;;  %v248_v38 = vmul.f32 %v226_v33, %v226_v33 }
  0x4d   : > { %v247_v39 = vmul.f32 0.25, %v245_v36  ;;  %v249_v40 = vmul.f32 %v227_v35, %v227_v35  ;;  %v250_v41 = vsub.f32 %v246_v37, %v248_v38 }
  0x4f   : > { %v251_v42 = vsub.f32 %v247_v39, %v249_v40  ;;  %v252_v43 = vmax.f32 %v250_v41, 0.0 }
  0x51   : > { %v253_v44 = vmax.f32 %v251_v42, 0.0  ;;  %v254_v45 = vadd.f32 1e-05, %v252_v43 }
  0x53   : > { %v255_v46 = vadd.f32 1e-05, %v253_v44  ;;  %483 = vrsqrt.f32 %v254_v45 }
  0x55   : > { %485 = vrsqrt.f32 %v255_v46 }
  0x5d   : > { %v484_v48 = vpop.eup %483 }
  0x5e   : > { %v265_v55 = vmul.f32 %v484_v48, %v226_v33 }
  0x5f   : > { %v486_v51 = vpop.eup %485 }
  0x60   : > { %v262_v54 = vcombine.low %v484_v48, %v486_v51  ;;  %v266_v56 = vmul.f32 %v486_v51, %v227_v35 }
  0x62   : > { %v264_v58 = vmul.f32 %v262_v54, %v207_v3  ;;  %v269_v59 = vcombine.low %v265_v55, %v266_v56 }
  0x64   : > { %v271_v61 = vsub.f32 %v264_v58, %v269_v59 }
  0xba   : > { %v275_v60 = vpop.permute.xlu0 %274 }
  0xbb   : > { %v282_v62 = vrot.slane %v275_v60, %v281_v57 }
  0xbd   : > { %v284_v0 = vmul.f32 %v282_v62, %v271_v61 }
  0xbe   : > { %v288_v63 = vpop.permute.xlu0 %287 }
  0xbf   : > { %v295_v1 = vrot.slane %v288_v63, %v281_v57 }
  0xc1   : > { %v297_v2 = vadd.f32 %v295_v1, %v284_v0 }
  0xc3   : > { %298 = vst [vmem:[%s204_s19] sm:$0xff] %v297_v2 }
  0xc4   : > { %530 = shalt.err (!%p527_p6)
}
  0xc5   : > { %s531_s5 = scalar_lea.hbm %s758_s28, 128  ;;  %s535_s6 = scalar_lea.hbm %s810_s3, 256 }
  0xc6   : > { %p532_p4 = scmp.ne.s32.totalorder %s758_s28, %s531_s5  ;;  %p536_p1 = scmp.lt.u32.totalorder %s758_s28, %s810_s3 }
  0xc7   : > { %p537_p2 = scmp.lt.u32.totalorder %s535_s6, %s531_s5  ;;  %p539_p8 = scmp.lt.u32.totalorder %s531_s5, %s758_s28 }
  0xc8   : > { %p533_p10 = pnand %p532_p4, %p819_p9 }
  0xc9   : > { %p538_p5 = por %p537_p2, %p536_p1 }
  0xca   : > { %p534_p12 = pneg %p533_p10 }
  0xcb   : > { %p540_p11 = por %p539_p8, %p538_p5 }
  0xcd   : > { %p541_p0 = pnand %p540_p11, %p534_p12 }
  0xcf   : > { %544 = shalt.err (!%p541_p0)
}
  0xd0   : > { %419 = dma.vmem_to_hbm [thread:$0]  (%p819_p9), %s760_s21, 128, %s758_s28, %s300_s29  }
  0xd1 PF: > { %s328_s18 = sand.u32 1, %s579_s12   ;;  %p820_p7 = scmp.ne.s32.totalorder %s815_s27, 0 }
  0xd2   : > { %p821_p13 = scmp.ge.s32.totalorder %s599_s17, 2  ;;  %s329_s24 = scalar_lea.sflag [#allocation4], %s328_s18 }
  0xd4   : > { %p426_p3 = pnand %p821_p13, %p820_p7 }
  0xd6   : > { %574 = dma.done.wait (!%p426_p3), %s329_s24, 128  }
  0xd7   : > { %576 = vsyncadd (!%p426_p3), %s329_s24, 4294967168  ;;  %s19_s17 = sadd.s32 1, %s599_s17   ;;  %s822_s12 = smov %s583_s13 }
  0xd8   : > { %p16_p6 = scmp.ge.s32.totalorder %s19_s17, 4   ;;  %s823_s13 = smov %s587_s14 }
  0xd9   : > { %s824_s14 = smov %s681_s26  ;;  %s825_s15 = smov %s595_s16 }
  0xda   : > { %s826_s16 = smov %s828_s20  ;;  %18 = sbr.rel (!%p16_p6) target bundleno = 6 (0x6), region = 77 }
  0xe1   :  { %334 = vsyncpa [#allocation3], 1 }
  0xe2   :  { %336 = vsyncpa [#allocation3 + $0x1], 1 }
  0xe3   :  { %337 = vsyncpa [#allocation4], 1 }
  0xe4   :  { %339 = vsyncpa [#allocation4 + $0x1], 1 }

</bundles_post_ra>
